<compile_context>
chip_gen: v5e
topology: v5e:2x2
jax: 0.10.0
libtpu: 0.0.40
codegen_flags: <defaults>
</compile_context>

<pallas_src>
import functools

import jax
import jax.numpy as jnp
from jax.experimental import pallas as pl
from jax.experimental.pallas import tpu as pltpu


# ---------------------------------------------------------------------------
# Hardware / tile-size helpers
# ---------------------------------------------------------------------------
def _tpu_vmem_and_cores():
    """(VMEM bytes per TensorCore, TensorCores per chip), with safe fallbacks."""
    vmem = None
    cores = 1
    try:
        kind = jax.devices()[0].device_kind.lower()
    except Exception:
        kind = ""
    if "v7" in kind:
        vmem, cores = 64 * 1024 * 1024, 2
    elif ("v5" in kind) or ("v6" in kind):
        vmem, cores = 128 * 1024 * 1024, 1
    try:
        vmem = int(pltpu.get_tpu_info().vmem_capacity_bytes)
    except Exception:
        pass
    if vmem is None:
        vmem = 64 * 1024 * 1024  # conservative default
    return vmem, cores


def _pick_hidden_tile(hidden):
    for c in (512, 256, 128):
        if hidden % c == 0:
            return c
    return hidden


def _choose_token_tile(T, dim, E, th, x_bytes, w_bytes, budget, cores):
    """Largest MXU-friendly token tile whose VMEM footprint fits the budget."""
    # Double-buffered weight streams per step: w13 (dim, 2*th) + w2 (th, dim).
    weight_bytes = (2 * dim * 2 * th + 2 * th * dim) * w_bytes

    def footprint(tm):
        xo = 2 * 2 * tm * dim * x_bytes  # x + out blocks, double-buffered
        acc = tm * dim * 4               # f32 accumulator scratch
        wt = 2 * tm * E * 4              # routing-weight slab
        return weight_bytes + xo + acc + wt

    cands = [c for c in (1024, 768, 512, 384, 256, 128) if T % c == 0]
    if cores >= 2:
        # Keep >= 2 token tiles so the "parallel" axis shards across both TCs.
        two = [c for c in cands if T // c >= 2]
        cands = two or cands
    for c in cands:
        if footprint(c) <= budget:
            return c
    return cands[-1] if cands else T


def prepare_moe_weights(w1, w3):
    """Interleave w1/w3 per hidden tile into one (E, dim, 2*hidden) tensor.

    Do this once at weight-load time; the kernel then needs a single fused
    up-projection stream per step instead of two.
    """
    E, dim, hidden = w1.shape
    th = _pick_hidden_tile(hidden)
    hT = hidden // th
    w13 = jnp.concatenate(
        [w1.reshape(E, dim, hT, th), w3.reshape(E, dim, hT, th)], axis=-1
    )
    return w13.reshape(E, dim, 2 * hidden)


# ---------------------------------------------------------------------------
# Expert kernel: grid = (token tiles, hidden tiles, active-expert slots).
# ---------------------------------------------------------------------------
def _moe_kernel(eid_ref, valid_ref, x_ref, wt_ref, w13_ref, w2_ref, o_ref,
                acc_ref):
    i = pl.program_id(0)   # token tile
    h = pl.program_id(1)   # hidden tile
    s = pl.program_id(2)   # active-expert slot
    n_h = pl.num_programs(1)
    n_s = pl.num_programs(2)

    @pl.when(jnp.logical_and(h == 0, s == 0))
    def _init():
        acc_ref[...] = jnp.zeros_like(acc_ref)

    # Padding slots repeat the previous slot's expert id (so their index_map
    # issues no new weight DMA). Computing them would double-count that expert,
    # so this guard is correctness-critical, not just a perf skip.
    @pl.when(valid_ref[i * n_s + s] != 0)
    def _compute():
        x = x_ref[...]           # (TM, dim)
        w13 = w13_ref[0]         # (dim, 2*TH) == [w1 tile | w3 tile]
        w2 = w2_ref[0]           # (TH, dim)
        th = w2.shape[0]

        h13 = jnp.dot(x, w13, preferred_element_type=jnp.float32)  # (TM, 2*TH)
        h1 = h13[:, :th]
        h3 = h13[:, th:]
        g = (h1 * jax.nn.sigmoid(h1)) * h3                          # SwiGLU f32

        # Per-token routing weight for this slot's expert: lane-select from the
        # (TM, E) slab resident for the whole token tile.
        e_id = eid_ref[i * n_s + s]
        wt = wt_ref[...].astype(jnp.float32)                        # (TM, E)
        lane = jax.lax.broadcasted_iota(jnp.int32, wt.shape, 1)
        wtok = jnp.sum(jnp.where(lane == e_id, wt, 0.0), axis=1,
                       keepdims=True)                               # (TM, 1)

        # Scale before the down-projection: (TM, TH) mul instead of (TM, dim).
        g = g * wtok
        acc_ref[...] += jnp.dot(g.astype(x.dtype), w2,
                                preferred_element_type=jnp.float32)

    @pl.when(jnp.logical_and(h == n_h - 1, s == n_s - 1))
    def _finalize():
        o_ref[...] = acc_ref[...].astype(o_ref.dtype)


def moe_experts_pallas(flat_x, w_dense, active_tok, w13, w2, *,
                       n_experts_per_tok=None):
    """flat_x: (T, dim); w_dense: (T, E) f32 routing weights (0 if unselected);
    active_tok: (T, E) bool selection mask; w13: (E, dim, 2*hidden) interleaved;
    w2: (E, hidden, dim) -> (T, dim)."""
    T, dim = flat_x.shape
    E, hidden, _ = w2.shape

    th = _pick_hidden_tile(hidden)
    hT = hidden // th

    vmem, cores = _tpu_vmem_and_cores()
    budget = int(vmem * 0.8)  # leave headroom for compiler scratch / spill
    x_bytes = jnp.dtype(flat_x.dtype).itemsize
    w_bytes = jnp.dtype(w13.dtype).itemsize
    TM = _choose_token_tile(T, dim, E, th, x_bytes, w_bytes, budget, cores)
    tT = T // TM

    # --- per-token-tile active-expert slot tables (SMEM via scalar prefetch) --
    act = active_tok.reshape(tT, TM, E).any(axis=1)                   # (tT, E)
    n_act = act.sum(axis=1).astype(jnp.int32)                         # (tT,)
    # Active experts first (ascending id), inactive after; unique sort keys so
    # no reliance on argsort stability.
    key = (jnp.where(act, 0, E).astype(jnp.int32)
           + jnp.arange(E, dtype=jnp.int32)[None, :])
    order = jnp.argsort(key, axis=1).astype(jnp.int32)                # (tT, E)
    slot = jnp.arange(E, dtype=jnp.int32)[None, :]
    valid = slot < n_act[:, None]                                     # (tT, E)
    last_eid = jnp.take_along_axis(order,
                                   jnp.maximum(n_act - 1, 0)[:, None], axis=1)
    eid_tbl = jnp.where(valid, order, last_eid)                       # (tT, E)
    eid_flat = eid_tbl.reshape(-1).astype(jnp.int32)
    valid_flat = valid.reshape(-1).astype(jnp.int32)

    k = n_experts_per_tok if n_experts_per_tok is not None else E
    frac = min(1.0, k / E)
    cost = pl.CostEstimate(
        flops=int(6 * T * dim * hidden * k),
        transcendentals=int(T * hidden * k),
        bytes_accessed=int(tT * E * frac * 3 * dim * hidden * w_bytes
                           + 2 * T * dim * x_bytes      # x read + out write
                           + T * E * 4),
    )

    return pl.pallas_call(
        _moe_kernel,
        out_shape=jax.ShapeDtypeStruct((T, dim), flat_x.dtype),
        grid_spec=pltpu.PrefetchScalarGridSpec(
            num_scalar_prefetch=2,
            grid=(tT, hT, E),
            in_specs=[
                # x: resident across (h, s) for the whole token tile
                pl.BlockSpec((TM, dim), lambda i, h, s, eid, vld: (i, 0)),
                # routing weights: lane-dense (TM, E) slab, once per token tile
                pl.BlockSpec((TM, E), lambda i, h, s, eid, vld: (i, 0)),
                # fused up-projection weights, indexed by this slot's expert id
                pl.BlockSpec((1, dim, 2 * th),
                             lambda i, h, s, eid, vld: (eid[i * E + s], 0, h)),
                # down-projection weights
                pl.BlockSpec((1, th, dim),
                             lambda i, h, s, eid, vld: (eid[i * E + s], h, 0)),
            ],
            out_specs=pl.BlockSpec((TM, dim), lambda i, h, s, eid, vld: (i, 0)),
            scratch_shapes=[pltpu.VMEM((TM, dim), jnp.float32)],
        ),
        compiler_params=pltpu.CompilerParams(
            dimension_semantics=("parallel", "arbitrary", "arbitrary"),
            vmem_limit_bytes=budget,
        ),
        cost_estimate=cost,
    )(eid_flat, valid_flat, flat_x, w_dense, w13, w2)


# ---------------------------------------------------------------------------
# Full MoE forward (routing glue in plain JAX, hot path in Pallas).
# ---------------------------------------------------------------------------
@functools.partial(jax.jit, static_argnames=("n_experts_per_tok",))
def moe_forward(x, gate_w, w13, w2, n_experts_per_tok):
    B, S, dim = x.shape
    E = gate_w.shape[1]
    flat_x = x.reshape(B * S, dim)

    # Gate: tiny (T, E) matmul -- plain XLA (lane width E << 128; a dedicated
    # Pallas call would be pure overhead and re-read all of flat_x).
    logits = jnp.dot(flat_x, gate_w, precision=jax.lax.Precision.HIGHEST)

    # top-k routing + softmax over selected logits (matches torch.topk+softmax)
    topk_vals, topk_idx = jax.lax.top_k(logits, n_experts_per_tok)     # (T, K)
    weights = jax.nn.softmax(topk_vals.astype(jnp.float32), axis=-1)   # f32

    one_hot = topk_idx[..., None] == jnp.arange(E)[None, None, :]      # (T,K,E)
    # Dense (T, E) routing weights (zero where unselected) + selection mask
    # (built from the selected indices, so zero-underflowing weights still
    #  route through the expert exactly like the PyTorch loop).
    w_dense = jnp.einsum("tk,tke->te", weights, one_hot.astype(jnp.float32))
    active_tok = one_hot.any(axis=1)                                   # (T, E)

    out = moe_experts_pallas(flat_x, w_dense, active_tok, w13, w2,
                             n_experts_per_tok=n_experts_per_tok)
    return out.reshape(B, S, dim)


# ---------------------------------------------------------------------------
# Pure-JAX reference (same math as the PyTorch module) for a sanity check.
# ---------------------------------------------------------------------------
def moe_reference(x, gate_w, w1, w3, w2, n_experts_per_tok):
    B, S, dim = x.shape
    E = gate_w.shape[1]
    flat_x = x.reshape(B * S, dim)
    logits = jnp.dot(flat_x, gate_w, precision=jax.lax.Precision.HIGHEST)
    topk_vals, topk_idx = jax.lax.top_k(logits, n_experts_per_tok)
    weights = jax.nn.softmax(topk_vals.astype(jnp.float32), axis=-1).astype(
        x.dtype
    )
    one_hot = jax.nn.one_hot(topk_idx, E, dtype=x.dtype)
    w_dense = jnp.einsum("tk,tke->te", weights, one_hot)               # (T, E)

    def expert(xe, e):
        h1 = xe @ w1[e]
        h3 = xe @ w3[e]
        return ((h1 * jax.nn.sigmoid(h1)) * h3) @ w2[e]

    out = jnp.zeros_like(flat_x)
    for e in range(E):
        out = out + w_dense[:, e:e + 1] * expert(flat_x, e)
    return out.reshape(B, S, dim)


if __name__ == "__main__":
    # small shapes consistent with the module
    B, S, dim = 2, 8, 32
    hidden = 64
    n_experts = 4
    n_experts_per_tok = 2

    key = jax.random.PRNGKey(0)
    kx, kg, k1, k3, k2 = jax.random.split(key, 5)

    x = jax.random.normal(kx, (B, S, dim), dtype=jnp.float32)
    gate_w = jax.random.normal(kg, (dim, n_experts), dtype=jnp.float32) * 0.1
    w1 = jax.random.normal(k1, (n_experts, dim, hidden), dtype=jnp.float32) * 0.1
    w3 = jax.random.normal(k3, (n_experts, dim, hidden), dtype=jnp.float32) * 0.1
    w2 = jax.random.normal(k2, (n_experts, hidden, dim), dtype=jnp.float32) * 0.1

    # One-time weight prep (w1 || w3 interleaved per hidden tile).
    w13 = prepare_moe_weights(w1, w3)

    out = moe_forward(x, gate_w, w13, w2, n_experts_per_tok)
    out = jax.block_until_ready(out)

    ref = moe_reference(x, gate_w, w1, w3, w2, n_experts_per_tok)
    assert out.shape == (B, S, dim)
    assert jnp.allclose(out, ref, atol=1e-4, rtol=1e-4), "mismatch vs reference"

    print("KERNEL_OK")
</pallas_src>

<mosaic_0001>
module attributes {stable_mosaic.version = 11 : i64} {
  func.func @_moe_kernel(%arg0: i32, %arg1: i32, %arg2: i32, %arg3: memref<4xi32, #tpu.memory_space<smem>>, %arg4: memref<4xi32, #tpu.memory_space<smem>>, %arg5: memref<16x32xf32, #tpu.memory_space<vmem>>, %arg6: memref<16x4xf32, #tpu.memory_space<vmem>>, %arg7: memref<1x32x128xf32, #tpu.memory_space<vmem>>, %arg8: memref<1x64x32xf32, #tpu.memory_space<vmem>>, %arg9: memref<16x32xf32, #tpu.memory_space<vmem>>, %arg10: memref<16x32xf32, #tpu.memory_space<vmem>>) attributes {dimension_semantics = [#tpu.dimension_semantics<parallel>, #tpu.dimension_semantics<arbitrary>, #tpu.dimension_semantics<arbitrary>], iteration_bounds = array<i64: 1, 1, 4>, scalar_prefetch = 2 : i64, scratch_operands = 1 : i64, tpu.core_type = #tpu.core_type<tc>, window_params = [{transform_indices = @transform_0, window_bounds = array<i64: 16, 32>}, {transform_indices = @transform_1, window_bounds = array<i64: 16, 4>}, {transform_indices = @transform_2, window_bounds = array<i64: 1, 32, 128>}, {transform_indices = @transform_3, window_bounds = array<i64: 1, 64, 32>}, {transform_indices = @transform_4, window_bounds = array<i64: 16, 32>}]} {
    %c0_i32 = arith.constant 0 : i32
    %0 = arith.cmpi eq, %arg1, %c0_i32 : i32
    %c0_i32_0 = arith.constant 0 : i32
    %1 = arith.cmpi eq, %arg2, %c0_i32_0 : i32
    %2 = arith.andi %0, %1 : i1
    %3 = arith.extui %2 : i1 to i32
    %c0_i32_1 = arith.constant 0 : i32
    %4 = arith.cmpi ne, %3, %c0_i32_1 : i32
    scf.if %4 {
      %cst = arith.constant 0.000000e+00 : f32
      %17 = vector.broadcast %cst : f32 to vector<16x32xf32>
      %c0 = arith.constant 0 : index
      %c0_6 = arith.constant 0 : index
      %18 = vector.load %arg10[%c0, %c0_6] : memref<16x32xf32, #tpu.memory_space<vmem>>, vector<16x32xf32>
      tpu.vector_store %arg10[%c0, %c0_6], %17 {strides = array<i32>} : memref<16x32xf32, #tpu.memory_space<vmem>>, vector<16x32xf32>,
    } else {
    }
    %c4_i32 = arith.constant 4 : i32
    %5 = arith.muli %arg0, %c4_i32 : i32
    %6 = arith.addi %5, %arg2 : i32
    %7 = arith.index_cast %6 : i32 to index
    %8 = memref.load %arg4[%7] : memref<4xi32, #tpu.memory_space<smem>>
    %c0_i32_2 = arith.constant 0 : i32
    %9 = arith.cmpi ne, %8, %c0_i32_2 : i32
    %10 = arith.extui %9 : i1 to i32
    %c0_i32_3 = arith.constant 0 : i32
    %11 = arith.cmpi ne, %10, %c0_i32_3 : i32
    scf.if %11 {
      %c0 = arith.constant 0 : index
      %c0_6 = arith.constant 0 : index
      %17 = vector.load %arg5[%c0, %c0_6] : memref<16x32xf32, #tpu.memory_space<vmem>>, vector<16x32xf32>
      %c0_7 = arith.constant 0 : index
      %c0_8 = arith.constant 0 : index
      %c0_9 = arith.constant 0 : index
      %18 = vector.load %arg7[%c0_7, %c0_8, %c0_9] : memref<1x32x128xf32, #tpu.memory_space<vmem>>, vector<1x32x128xf32>
      %19 = vector.shape_cast %18 : vector<1x32x128xf32> to vector<32x128xf32>
      %c0_10 = arith.constant 0 : index
      %c0_11 = arith.constant 0 : index
      %c0_12 = arith.constant 0 : index
      %20 = vector.load %arg8[%c0_10, %c0_11, %c0_12] : memref<1x64x32xf32, #tpu.memory_space<vmem>>, vector<1x64x32xf32>
      %21 = vector.shape_cast %20 : vector<1x64x32xf32> to vector<64x32xf32>
      %cst = arith.constant dense<0.000000e+00> : vector<16x128xf32>
      %22 = tpu.matmul %17, %19, %cst {dimension_numbers = #tpu.dot_dimension_numbers<[1], [0], [0], [1], [0, 0, 1, 1], [], []>} : vector<16x32xf32>, vector<32x128xf32>, vector<16x128xf32> -> vector<16x128xf32>
      %23 = vector.extract_strided_slice %22 {offsets = [0, 0], sizes = [16, 64], strides = [1, 1]} : vector<16x128xf32> to vector<16x64xf32>
      %24 = vector.extract_strided_slice %22 {offsets = [0, 64], sizes = [16, 64], strides = [1, 1]} : vector<16x128xf32> to vector<16x64xf32>
      %25 = arith.negf %23 : vector<16x64xf32>
      %26 = math.exp %25 : vector<16x64xf32>
      %cst_13 = arith.constant 1.000000e+00 : f32
      %27 = vector.broadcast %cst_13 : f32 to vector<16x64xf32>
      %28 = arith.addf %27, %26 : vector<16x64xf32>
      %29 = arith.divf %27, %28 : vector<16x64xf32>
      %30 = arith.mulf %23, %29 : vector<16x64xf32>
      %31 = arith.mulf %30, %24 : vector<16x64xf32>
      %c4_i32_14 = arith.constant 4 : i32
      %32 = arith.muli %arg0, %c4_i32_14 : i32
      %33 = arith.addi %32, %arg2 : i32
      %34 = arith.index_cast %33 : i32 to index
      %35 = memref.load %arg3[%34] : memref<4xi32, #tpu.memory_space<smem>>
      %c0_15 = arith.constant 0 : index
      %c0_16 = arith.constant 0 : index
      %36 = vector.load %arg6[%c0_15, %c0_16] : memref<16x4xf32, #tpu.memory_space<vmem>>, vector<16x4xf32>
      %37 = tpu.iota {dimensions = array<i32: 1>} : vector<16x4xi32>
      %38 = vector.broadcast %35 : i32 to vector<16x4xi32>
      %39 = arith.cmpi eq, %37, %38 : vector<16x4xi32>
      %cst_17 = arith.constant 0.000000e+00 : f32
      %40 = vector.broadcast %cst_17 : f32 to vector<16x4xf32>
      %41 = arith.select %39, %36, %40 : vector<16x4xi1>, vector<16x4xf32>
      %cst_18 = arith.constant dense<0.000000e+00> : vector<16xf32>
      %42 = vector.multi_reduction <add>, %41, %cst_18 [1] : vector<16x4xf32> to vector<16xf32>
      %43 = vector.shape_cast %42 : vector<16xf32> to vector<16x1xf32>
      %44 = vector.broadcast %43 : vector<16x1xf32> to vector<16x64xf32>
      %45 = arith.mulf %31, %44 : vector<16x64xf32>
      %c0_19 = arith.constant 0 : index
      %c0_20 = arith.constant 0 : index
      %46 = vector.load %arg10[%c0_19, %c0_20] : memref<16x32xf32, #tpu.memory_space<vmem>>, vector<16x32xf32>
      %cst_21 = arith.constant dense<0.000000e+00> : vector<16x32xf32>
      %47 = tpu.matmul %45, %21, %cst_21 {dimension_numbers = #tpu.dot_dimension_numbers<[1], [0], [0], [1], [0, 0, 1, 1], [], []>} : vector<16x64xf32>, vector<64x32xf32>, vector<16x32xf32> -> vector<16x32xf32>
      %48 = arith.addf %46, %47 : vector<16x32xf32>
      %c0_22 = arith.constant 0 : index
      %c0_23 = arith.constant 0 : index
      %49 = vector.load %arg10[%c0_22, %c0_23] : memref<16x32xf32, #tpu.memory_space<vmem>>, vector<16x32xf32>
      tpu.vector_store %arg10[%c0_22, %c0_23], %48 {strides = array<i32>} : memref<16x32xf32, #tpu.memory_space<vmem>>, vector<16x32xf32>,
    } else {
    }
    %c0_i32_4 = arith.constant 0 : i32
    %12 = arith.cmpi eq, %arg1, %c0_i32_4 : i32
    %c3_i32 = arith.constant 3 : i32
    %13 = arith.cmpi eq, %arg2, %c3_i32 : i32
    %14 = arith.andi %12, %13 : i1
    %15 = arith.extui %14 : i1 to i32
    %c0_i32_5 = arith.constant 0 : i32
    %16 = arith.cmpi ne, %15, %c0_i32_5 : i32
    scf.if %16 {
      %c0 = arith.constant 0 : index
      %c0_6 = arith.constant 0 : index
      %17 = vector.load %arg10[%c0, %c0_6] : memref<16x32xf32, #tpu.memory_space<vmem>>, vector<16x32xf32>
      %c0_7 = arith.constant 0 : index
      %c0_8 = arith.constant 0 : index
      %18 = vector.load %arg9[%c0_7, %c0_8] : memref<16x32xf32, #tpu.memory_space<vmem>>, vector<16x32xf32>
      tpu.vector_store %arg9[%c0_7, %c0_8], %17 {strides = array<i32>} : memref<16x32xf32, #tpu.memory_space<vmem>>, vector<16x32xf32>,
    } else {
    }
    return
  }
  func.func @transform_0(%arg0: i32, %arg1: i32, %arg2: i32, %arg3: memref<4xi32, #tpu.memory_space<smem>>, %arg4: memref<4xi32, #tpu.memory_space<smem>>) -> (i32, i32) {
    %c0_i32 = arith.constant 0 : i32
    %c0_i32_0 = arith.constant 0 : i32
    return %arg0, %c0_i32 : i32, i32
  }
  func.func @transform_1(%arg0: i32, %arg1: i32, %arg2: i32, %arg3: memref<4xi32, #tpu.memory_space<smem>>, %arg4: memref<4xi32, #tpu.memory_space<smem>>) -> (i32, i32) {
    %c0_i32 = arith.constant 0 : i32
    %c0_i32_0 = arith.constant 0 : i32
    return %arg0, %c0_i32 : i32, i32
  }
  func.func @transform_2(%arg0: i32, %arg1: i32, %arg2: i32, %arg3: memref<4xi32, #tpu.memory_space<smem>>, %arg4: memref<4xi32, #tpu.memory_space<smem>>) -> (i32, i32, i32) {
    %c4_i32 = arith.constant 4 : i32
    %0 = arith.muli %arg0, %c4_i32 : i32
    %1 = arith.addi %0, %arg2 : i32
    %2 = arith.index_cast %1 : i32 to index
    %3 = memref.load %arg3[%2] : memref<4xi32, #tpu.memory_space<smem>>
    %c0_i32 = arith.constant 0 : i32
    %c0_i32_0 = arith.constant 0 : i32
    return %3, %c0_i32, %arg1 : i32, i32, i32
  }
  func.func @transform_3(%arg0: i32, %arg1: i32, %arg2: i32, %arg3: memref<4xi32, #tpu.memory_space<smem>>, %arg4: memref<4xi32, #tpu.memory_space<smem>>) -> (i32, i32, i32) {
    %c4_i32 = arith.constant 4 : i32
    %0 = arith.muli %arg0, %c4_i32 : i32
    %1 = arith.addi %0, %arg2 : i32
    %2 = arith.index_cast %1 : i32 to index
    %3 = memref.load %arg3[%2] : memref<4xi32, #tpu.memory_space<smem>>
    %c0_i32 = arith.constant 0 : i32
    %c0_i32_0 = arith.constant 0 : i32
    return %3, %arg1, %c0_i32 : i32, i32, i32
  }
  func.func @transform_4(%arg0: i32, %arg1: i32, %arg2: i32, %arg3: memref<4xi32, #tpu.memory_space<smem>>, %arg4: memref<4xi32, #tpu.memory_space<smem>>) -> (i32, i32) {
    %c0_i32 = arith.constant 0 : i32
    %c0_i32_0 = arith.constant 0 : i32
    return %arg0, %c0_i32 : i32, i32
  }
}

</mosaic_0001>

<bundles_post_ra>
// kernel: moe_forward.1
= control target key start
LH: loop header
LB: loop body
LE: loop exit
PB: predicated region body
PF: predicated region fallthrough
CT: control target
= control target key end

     0   :  { %s818_s27 = smov [#allocation4]   ;;  %s819_s28 = smov [#allocation5]   ;;  %s949_s0 = inlined_call_operand.vmem [shape: s32[4], index: 0, kind: input, shape index: {}]   ;;  %s950_s2 = inlined_call_operand.vmem [shape: f32[16,32], index: 2, kind: input, shape index: {}]   ;;  %s951_s3 = inlined_call_operand.vmem [shape: f32[16,4], index: 3, kind: input, shape index: {}]   ;;  %s952_s4 = inlined_call_operand.vmem [shape: f32[4,32,128], index: 4, kind: input, shape index: {}]   ;;  %s953_s5 = inlined_call_operand.vmem [shape: f32[4,64,32], index: 5, kind: input, shape index: {}]   ;;  %s954_s6 = inlined_call_operand.hbm [shape: f32[16,32], index: 6, kind: output, shape index: {}]   ;;  %s955_s1 = inlined_call_operand.vmem [shape: s32[4], index: 1, kind: input, shape index: {}]  }
   0x1   :  { %s12_s23 = sshll.u32 %s949_s0, 4  ;;  %s17_s26 = sshll.u32 %s955_s1, 4  ;;  %s13_s23 = int_to_ptr.vmem [resolvable:$true] %s12_s23  ;;  %s18_s26 = int_to_ptr.vmem [resolvable:$true] %s17_s26 }
   0x2   :  { %15 = dma.vmem_to_smem %s13_s23, 16, %s818_s27, [#allocation3] }
   0x3   :  { %20 = dma.vmem_to_smem %s18_s26, 16, %s819_s28, [#allocation3] }
   0x4   :  { %800 = dma.done.wait [#allocation3], 32 }
   0x5   :  { %801 = vsyncadd [#allocation3], 4294967264 }
   0x6   :  { %23 = sfence }
   0x7   :  { %24 = vsyncpa [#allocation7], 0  ;;  %s866_s29 = smov 0   ;;  %s868_s30 = smov 0  }
   0x8   :  { %s870_s7 = smov 0  }
   0x9 LB: > { %s652_s0 = sadd.s32 4294967295, %s816_s7   ;;  %s42_s1 = sadd.s32 1, %s812_s30  ;;  %s816_s7 = sphi %s870_s7, %s30_s7   ;;  %s812_s30 = sphi %s868_s30, %s957_s30   ;;  %s808_s29 = sphi %s866_s29, %s956_s29  }
   0xa   : > { %p43_p0 = scmp.ge.s32.totalorder %s42_s1, 4  ;;  %p657_p1 = scmp.ge.s32.totalorder %s816_s7, 1 }
   0xb   : > { %p265_p2 = scmp.lt.s32.totalorder %s816_s7, 5 }
   0xc   : > { %s959_s1 = smov (%p43_p0, %s42_s1), 0 }
   0xd   : > { %p266_p3 = pnand %p657_p1, %p265_p2 }
   0xe   : > { %s328_s8 = sld [smem:[#allocation4 + %s808_s29]] (!%p266_p3)  ;;  %p358_p4 = scmp.eq.s32.totalorder (!%p266_p3), %s808_s29, 0 }
   0xf   : > { %269 = sbr.rel (%p266_p3) target bundleno = 488 (0x1e8), region = 36  ;;  %s342_s9 = sld [smem:[#allocation4 + %s808_s29]] (!%p266_p3) }
  0x14   : > { %p329_p5 = scmp.lt.s32.totalorder %s328_s8, 3  ;;  %vm363_vm0 = vcmask (%p358_p4), 261120   ;;  %v820_v0 = vmov (%p358_p4), 0.0  }
  0x15   : > { %p344_p6 = scmp.lt.s32.totalorder %s342_s9, 3  ;;  %362 = sbr.rel (!%p358_p4) target bundleno = 26 (0x1a), region = 40  ;;  %364 = vst.msk [vmem:[#allocation2] sm:$0xff] (%p358_p4), %vm363_vm0, %v820_v0 }
  0x16   : > { %s961_s8 = smov (!%p329_p5, %s328_s8), 3  ;;  %365 = vst.msk [vmem:[#allocation2 + $0x8] sm:$0xff] (%p358_p4), %vm363_vm0, %v820_v0 }
  0x17   : > { %s963_s9 = smov (!%p344_p6, %s342_s9), 3  ;;  %s675_s10 = sshll.u32 %s961_s8, 5 }
  0x18   : > { %s336_s13 = scalar_lea.vmem %s952_s4, %s675_s10  ;;  %s676_s14 = sshll.u32 %s963_s9, 6 }
  0x19   : > { %s896_s17 = scalar_lea.vmem %s953_s5, %s676_s14 }
  0x1a PF: > { %s368_s18 = sld [smem:[#allocation5 + %s808_s29]] }
  0x20   : > { %p663_p7 = scmp.eq.s32.totalorder %s368_s18, 0 }
  0x21   : > { %s821_s23 = smov (!%p663_p7), 64   ;;  %s467_s24 = sld [smem:[#allocation4 + %s808_s29]] (!%p663_p7) }
  0x22   : > { %372 = sbr.rel (%p663_p7) target bundleno = 474 (0x1da), region = 44 }
  0x27   : > { %v378_v1 = vld [vmem:[%s336_s13 + $0x18] sm:$0xff]  ;;  %v377_v2 = vld [vmem:[%s336_s13 + $0x10] sm:$0xff]  ;;  %v376_v3 = vld [vmem:[%s336_s13 + $0x8] sm:$0xff]  ;;  %vm387_vm1 = vcmask 261120   ;;  %v470_v9 = vlaneseq  ;;  %v472_v11 = vstv %s467_s24  ;;  %vm476_vm3 = vcmask 31744  }
  0x28   : > { %406 = vmatpush.msra.mxu0 %v378_v1  ;;  %679 = vmatpush.msra.mxu3 %v378_v1  ;;  %v375_v4 = vld [vmem:[%s336_s13] sm:$0xff]  ;;  %v374_v6 = vld [vmem:[%s950_s2 + $0x8] sm:$0xff]  ;;  %v386_v18 = vld [vmem:[%s896_s17 + $0x38] sm:$0xff]  ;;  %vm487_vm12 = vcmask 523264  }
  0x29   : > { %v373_v5 = vld [vmem:[%s950_s2] sm:$0xff]  ;;  %v471_v10 = vand.u32 127, %v470_v9  ;;  %v469_v15 = vld [vmem:[%s951_s3 + $0x8] sm:$0xff]  ;;  %v385_v19 = vld [vmem:[%s896_s17 + $0x30] sm:$0xff]  ;;  %502 = vmatpush.msra.mxu1 %v386_v18  ;;  %683 = vmatpush.msra.mxu2 %v386_v18 }
  0x2a   : > { %407 = vmatpush.msra.mxu0 %v377_v2  ;;  %680 = vmatpush.msra.mxu3 %v377_v2  ;;  %v468_v12 = vld [vmem:[%s951_s3] sm:$0xff]  ;;  %v384_v20 = vld [vmem:[%s896_s17 + $0x28] sm:$0xff]  ;;  %v382_v22 = vld [vmem:[%s896_s17 + $0x18] sm:$0xff] }
  0x2b   : > { %vm473_vm2 = vcmp.eq.s32.totalorder %v471_v10, %v472_v11  ;;  %503 = vmatpush.msra.mxu1 %v385_v19  ;;  %684 = vmatpush.msra.mxu2 %v385_v19  ;;  %v383_v21 = vld [vmem:[%s896_s17 + $0x20] sm:$0xff]  ;;  %v381_v23 = vld [vmem:[%s896_s17 + $0x10] sm:$0xff]  ;;  %v380_v24 = vld [vmem:[%s896_s17 + $0x8] sm:$0xff] }
  0x2c   : > { %408 = vmatpush.msra.mxu0 %v376_v3  ;;  %681 = vmatpush.msra.mxu3 %v376_v3  ;;  %v474_v13 = vsel %vm473_vm2, %v468_v12, 0.0  ;;  %v475_v16 = vsel %vm473_vm2, %v469_v15, 0.0  ;;  %v379_v31 = vld [vmem:[%s896_s17] sm:$0xff]  ;;  %v486_v1 = vld [vmem:[#allocation2 + $0x8] sm:$0xff] }
  0x2d   : > { %v477_v14 = vsel %vm476_vm3, %v474_v13, 0.0  ;;  %v480_v17 = vsel %vm476_vm3, %v475_v16, 0.0  ;;  %504 = vmatpush.msra.mxu1 %v384_v20  ;;  %685 = vmatpush.msra.mxu2 %v384_v20  ;;  %v485_v62 = vld [vmem:[#allocation2] sm:$0xff] }
  0x2e   : > { %409 = vmatpush.msra.mxu0 %v375_v4  ;;  %682 = vmatpush.msra.mxu3 %v375_v4 }
  0x2f   : > { %664 = vmatmul.msk.f32.vlgmr.msra.gmra.mxu0 %vm387_vm1, %v373_v5  ;;  %665 = vmatmul.msk.f32.vlgmr.msra.gmra.mxu3 %vm387_vm1, %v374_v6 }
  0x30   : > { %505 = vmatpush.msra.mxu1 %v383_v21  ;;  %686 = vmatpush.msra.mxu2 %v383_v21 }
  0x32   : > { %506 = vmatpush.msra.mxu1 %v382_v22  ;;  %687 = vmatpush.msra.mxu2 %v382_v22 }
  0x34   : > { %507 = vmatpush.msra.mxu1 %v381_v23  ;;  %688 = vmatpush.msra.mxu2 %v381_v23 }
  0x36   : > { %508 = vmatpush.msra.mxu1 %v380_v24  ;;  %689 = vmatpush.msra.mxu2 %v380_v24 }
  0x38   : > { %509 = vmatpush.msra.mxu1 %v379_v31  ;;  %690 = vmatpush.msra.mxu2 %v379_v31 }
  0xac   : > { %v907_v7 = vpop.f32.mrf.mxu0 }
  0xad   : > { %459 = vrot.lane.b32.xlu1 %v907_v7, %s821_s23  ;;  %v666_v25 = vmul.f32 -1.442695, %v907_v7 }
  0xaf   : > { %728 = vpow2.f32 %v666_v25 }
  0xb2   : > { %v910_v8 = vpop.f32.mrf.mxu3 }
  0xb3   : > { %461 = vrot.lane.b32.xlu0 %v910_v8, %s821_s23  ;;  %v667_v26 = vmul.f32 -1.442695, %v910_v8 }
  0xb5   : > { %v729_v27 = vpop.eup %728  ;;  %730 = vpow2.f32 %v667_v26 }
  0xb6   : > { %v423_v28 = vadd.f32 1.0, %v729_v27 }
  0xb8   : > { %732 = vrcp.f32 %v423_v28  ;;  %vm430_vm4 = vweird.f32 %v423_v28  ;;  %v436_v39 = vand.u32 2147483648, %v423_v28  ;;  %v434_v41 = vand.u32 2147483647, %v423_v28 }
  0xba   : > { %v437_v43 = vor.u32 1.1754944e-38, %v436_v39  ;;  %vm435_vm7 = vcmp.eq.f32.partialorder %v434_v41, 8.507059e+37 }
  0xbb   : > { %v731_v29 = vpop.eup %730 }
  0xbc   : > { %v424_v30 = vadd.f32 1.0, %v731_v29 }
  0xbe   : > { %v733_v32 = vpop.eup %732  ;;  %734 = vrcp.f32 %v424_v30  ;;  %v451_v48 = vand.u32 2147483648, %v424_v30  ;;  %vm445_vm9 = vweird.f32 %v424_v30  ;;  %v449_v49 = vand.u32 2147483647, %v424_v30 }
  0xbf   : > { %v426_v33 = vmul.f32 %v733_v32, %v423_v28  ;;  %vm431_vm5 = vweird.f32 %v733_v32 }
  0xc0   : > { %vm432_vm6 = vmor %vm430_vm4, %vm431_vm5  ;;  %v452_v52 = vor.u32 1.1754944e-38, %v451_v48  ;;  %vm450_vm11 = vcmp.eq.f32.partialorder %v449_v49, 8.507059e+37 }
  0xc1   : > { %v427_v35 = vsub.f32 1.0, %v426_v33 }
  0xc3   : > { %v428_v37 = vmul.f32 %v733_v32, %v427_v35 }
  0xc4   : > { %v735_v34 = vpop.eup %734 }
  0xc5   : > { %v441_v36 = vmul.f32 %v735_v34, %v424_v30  ;;  %v429_v40 = vadd.f32 %v733_v32, %v428_v37  ;;  %vm446_vm8 = vweird.f32 %v735_v34 }
  0xc6   : > { %vm447_vm10 = vmor %vm445_vm9, %vm446_vm8 }
  0xc7   : > { %v442_v38 = vsub.f32 1.0, %v441_v36  ;;  %v433_v44 = vsel %vm432_vm6, %v733_v32, %v429_v40 }
  0xc8   : > { %v438_v47 = vsel %vm435_vm7, %v437_v43, %v433_v44 }
  0xc9   : > { %v443_v42 = vmul.f32 %v735_v34, %v442_v38  ;;  %v455_v50 = vmul.f32 %v438_v47, %v907_v7 }
  0xcb   : > { %v444_v46 = vadd.f32 %v735_v34, %v443_v42 }
  0xcd   : > { %v448_v51 = vsel %vm447_vm10, %v735_v34, %v444_v46 }
  0xce   : > { %v453_v55 = vsel %vm450_vm11, %v452_v52, %v448_v51 }
  0xcf   : > { %v456_v58 = vmul.f32 %v453_v55, %v910_v8 }
  0xd7   : > { %478 = vadd.xlane.f32.xlu1 %v477_v14 }
  0xdd   : > { %481 = vadd.xlane.f32.xlu0 %v480_v17 }
 0x11f   : > { %v460_v45 = vpop.permute.xlu1 %459 }
 0x120   : > { %v465_v54 = vmul.f32 %v460_v45, %v455_v50 }
 0x125   : > { %v462_v53 = vpop.permute.xlu0 %461 }
 0x126   : > { %v466_v59 = vmul.f32 %v462_v53, %v456_v58 }
 0x14a   : > { %v479_v56 = vpop.xlane.xlu1 %478 }
 0x14b   : > { %v483_v57 = vmul.f32 %v479_v56, %v465_v54 }
 0x14d   : > { %668 = vmatmul.msk.f32.vlgmr.msra.gmra.mxu1 %vm487_vm12, %v483_v57 }
 0x150   : > { %v482_v60 = vpop.xlane.xlu0 %481 }
 0x151   : > { %v484_v61 = vmul.f32 %v482_v60, %v466_v59 }
 0x153   : > { %669 = vmatmul.msk.f32.vlgmr.msra.gmra.mxu2 %vm487_vm12, %v484_v61 }
 0x1ca   : > { %v511_v63 = vpop.f32.mrf.mxu1 }
 0x1cb   : > { %v517_v0 = vadd.f32 %v511_v63, %v485_v62 }
 0x1cd   : > { %519 = vst.msk [vmem:[#allocation2] sm:$0xff] %vm387_vm1, %v517_v0 }
 0x1d6   : > { %v514_v2 = vpop.f32.mrf.mxu2 }
 0x1d7   : > { %v518_v3 = vadd.f32 %v514_v2, %v486_v1 }
 0x1d9   : > { %520 = vst.msk [vmem:[#allocation2 + $0x8] sm:$0xff] %vm387_vm1, %v518_v3 }
 0x1da PF: > { %p521_p8 = scmp.eq.s32.totalorder %s808_s29, 3 }
 0x1db   : > { %v526_v4 = vld [vmem:[#allocation2] sm:$0xff] (%p521_p8)  ;;  %vm528_vm13 = vcmask (%p521_p8), 261120  }
 0x1dc   : > { %525 = sbr.rel (!%p521_p8) target bundleno = 482 (0x1e2), region = 48  ;;  %529 = vst.msk [vmem:[#allocation6] sm:$0xff] (%p521_p8), %vm528_vm13, %v526_v4 }
 0x1e0   : > { %v527_v5 = vld [vmem:[#allocation2 + $0x8] sm:$0xff] (%p521_p8) }
 0x1e1   : > { %530 = vst.msk [vmem:[#allocation6 + $0x8] sm:$0xff] %vm528_vm13, %v527_v5 }
 0x1e2 PF: > { %p695_p9 = scmp.eq.s32.totalorder %s652_s0, 3  ;;  %s541_s10 = sshll.u32 %s954_s6, 4  ;;  %s542_s10 = int_to_ptr.hbm [resolvable:$true] %s541_s10 }
 0x1e3   : > { %s822_s11 = smov [#allocation6]   ;;  %s823_s13 = smov 128  }
 0x1e4   : > { %s539_s12 = sshll.u32 %s822_s11, 4  ;;  %s824_s29 = smov 8   ;;  %s540_s12 = int_to_ptr.vmem [resolvable:$true] %s539_s12 }
 0x1e5   : > { %692 = dma.vmem_to_hbm [thread:$0]  (%p695_p9), %s540_s12, 256, %s542_s10, [#allocation7], %s823_s13, %s823_s13, %s824_s29  }
 0x1e6   : > { %803 = dma.done.wait (%p695_p9), [#allocation7], 256  }
 0x1e7   : > { %805 = vsyncadd (%p695_p9), [#allocation7], 4294967040 }
 0x1e8 PF: > { %s30_s7 = sadd.s32 1, %s816_s7   ;;  %s956_s29 = smov %s812_s30 }
 0x1e9   : > { %p27_p10 = scmp.ge.s32.totalorder %s30_s7, 6   ;;  %s957_s30 = smov %s959_s1 }
 0x1eb   :  { %29 = sbr.rel (!%p27_p10) target bundleno = 9 (0x9), region = 85 }
 0x1f0   :  { %558 = vsyncpa [#allocation7], 1 }
 0x1f1   :  { %560 = vsyncpa [#allocation7 + $0x1], 1 }

</bundles_post_ra>
